<compile_context>
chip_gen: v6e
topology: v6e:2x2x1
jax: 0.10.0
libtpu: 0.0.40
codegen_flags: <defaults>
</compile_context>

<pallas_src>
import functools
import math

import jax
import jax.numpy as jnp
import numpy as np
from jax.experimental import pallas as pl
from jax.experimental.pallas import tpu as pltpu


# ---------------------------------------------------------------------------
# Chip facts (generation-aware tiling / VMEM decisions).
# ---------------------------------------------------------------------------
@functools.lru_cache(maxsize=1)
def _chip_facts():
    """(num_tensorcores, mxu_contraction_depth, per-core VMEM bytes)."""
    kind = ""
    try:
        kind = jax.devices()[0].device_kind.lower()
    except Exception:
        pass
    num_cores = 2 if "v7" in kind else 1                      # v7x: 2 TCs/chip
    mxu_depth = 128 if ("v5e" in kind or "v5 lite" in kind
                        or "v5litepod" in kind) else 256      # v5e MXU K=128
    vmem_cap = (64 << 20) if "v7" in kind else (128 << 20)
    try:  # prefer the trace-time query when available
        vmem_cap = int(getattr(pltpu.get_tpu_info(), "vmem_capacity_bytes",
                               vmem_cap))
    except Exception:
        pass
    return num_cores, mxu_depth, vmem_cap


def _vmem_limit_bytes(need: int, vmem_cap: int) -> int:
    # Never ask for the whole physical VMEM: leave >=16 MiB headroom for
    # compiler scratch (matters on v7x where a TC only has 64 MiB).
    ceiling = max(vmem_cap - (16 << 20), 24 << 20)
    return int(min(max(need + (8 << 20), 24 << 20), ceiling))


def _weight_spec(block_shape, index_map, single_buffer: bool):
    """BlockSpec for grid-invariant weight inputs.

    Their index_map is constant across the grid, so single-buffering halves
    their VMEM footprint (default is double-buffered).  Falls back to the
    default spec if this Pallas version has no pipeline_mode kwarg.
    """
    if single_buffer:
        try:
            return pl.BlockSpec(block_shape, index_map,
                                pipeline_mode=pl.Buffered(1))
        except (TypeError, AttributeError):
            pass
    return pl.BlockSpec(block_shape, index_map)


def _compute_dtype(dtype):
    # uint8 values (0..255) are exact in bf16 and the MXU has no native f32 or
    # int path (v7x has no int MXU path at all), so integer images compute in
    # bf16.  f32 images keep the bit-faithful f32 path (matches PyTorch f32).
    if dtype == jnp.bfloat16 or jnp.issubdtype(dtype, jnp.integer):
        return jnp.bfloat16
    return jnp.float32


# ---------------------------------------------------------------------------
# Bilinear weights (PyTorch align_corners=False semantics).
# ---------------------------------------------------------------------------
def _bilinear_weight_matrix(out_size: int, in_size: int) -> jnp.ndarray:
    """(out_size, in_size) matrix s.t. W @ x does 1-D bilinear resize."""
    scale = in_size / out_size
    i = jnp.arange(out_size, dtype=jnp.float32)
    src = (i + 0.5) * scale - 0.5
    src = jnp.maximum(src, 0.0)          # PyTorch clamps negative source coords
    i0 = jnp.floor(src)
    frac = src - i0
    i0 = i0.astype(jnp.int32)
    i1 = jnp.clip(i0 + 1, 0, in_size - 1)
    i0 = jnp.clip(i0, 0, in_size - 1)
    w = (jax.nn.one_hot(i0, in_size, dtype=jnp.float32) * (1.0 - frac)[:, None]
         + jax.nn.one_hot(i1, in_size, dtype=jnp.float32) * frac[:, None])
    return w


def _finalize(out_f32, o_ref):
    if jnp.issubdtype(o_ref.dtype, jnp.integer):
        info = jnp.iinfo(o_ref.dtype)
        # TODO(synk): jnp.round is half-to-even; PyTorch's uint8 path may
        # differ by 1 LSB on exact .5 ties.
        out_f32 = jnp.clip(jnp.round(out_f32), info.min, info.max)
    return out_f32.astype(o_ref.dtype)


# ---------------------------------------------------------------------------
# Kernels.
# ---------------------------------------------------------------------------
def _fused_resize_kernel(x_ref, w_ref, o_ref, *, compute_dtype):
    # x_ref: (PB, Hin*Win)   PB planes as MXU rows
    # w_ref: (Hin*Win, Hout*Wout)  = (W_h kron W_w)^T
    # o_ref: (PB, Hout*Wout)
    out = jnp.dot(x_ref[...].astype(compute_dtype), w_ref[...],
                  preferred_element_type=jnp.float32)
    o_ref[...] = _finalize(out, o_ref)


def _packed_resize_kernel(x_ref, wh_ref, wwd_ref, o_ref, *, compute_dtype):
    # x_ref  : (1, H_in,  TB*W_in )  TB planes packed along the lane dim
    # wh_ref : (H_out, H_in)         height interpolation matrix
    # wwd_ref: (TB*W_in, TB*W_out)   block-diagonal width matrix (transposed)
    # o_ref  : (1, H_out, TB*W_out)
    x = x_ref[0].astype(compute_dtype)
    t = jnp.dot(wh_ref[...], x, preferred_element_type=jnp.float32)
    out = jnp.dot(t.astype(compute_dtype), wwd_ref[...],
                  preferred_element_type=jnp.float32)
    o_ref[0] = _finalize(out, o_ref)


# ---------------------------------------------------------------------------
# Tiling heuristics.
# ---------------------------------------------------------------------------
def _choose_fused_rows(p: int, num_cores: int):
    """Planes (MXU rows) per grid step for the fused path."""
    p8 = ((p + 7) // 8) * 8            # sublane alignment
    pb = min(p8, 1024)
    nb = math.ceil(p8 / pb)
    if num_cores > 1:                  # v7x: give each TC >= 2 steps if possible
        target = 2 * num_cores
        while nb < target and pb > 8:
            pb = max(8, ((pb // 2 + 7) // 8) * 8)
            nb = math.ceil(p8 / pb)
    return pb, nb


def _choose_plane_block(p: int, w_in: int, w_out: int,
                        num_cores: int, mxu_depth: int):
    """Planes packed per grid step for the lane-packed two-matmul path."""
    lane = max(1, min(w_in, w_out))
    # Lane density of the OUTPUT block is the biggest measured lever: make
    # both tb*w_in and tb*w_out >= ~128 lanes.
    tb = max(1, min(p, math.ceil(128 / lane)))
    # v5e: MXU contraction depth is 128 — avoid tb*w_in landing just above it
    # (a second, mostly-zero K pass), unless that would lose lane density.
    if mxu_depth <= 128 and tb * w_in > mxu_depth and w_in <= mxu_depth:
        tb_small = max(1, mxu_depth // w_in)
        if tb_small * lane >= 128:
            tb = tb_small
    nb = math.ceil(p / tb)
    # Multi-TC chips only (v7x): make sure every core gets >= 2 grid steps so
    # the block DMAs stay hidden behind compute — never below 128 out-lanes.
    if num_cores > 1 and nb < 2 * num_cores:
        tb_try = max(1, math.ceil(p / (2 * num_cores)))
        if tb_try * lane >= 128:
            tb = tb_try
            nb = math.ceil(p / tb)
    return tb, nb


# ---------------------------------------------------------------------------
# Main resize (jitted; output size is static).
# ---------------------------------------------------------------------------
@functools.partial(jax.jit,
                   static_argnames=("out_h", "out_w", "buffered_weights"))
def _bilinear_resize_nchw(img, out_h: int, out_w: int,
                          buffered_weights: bool = True):
    n, c, h_in, w_in = img.shape
    p = n * c
    num_cores, mxu_depth, vmem_cap = _chip_facts()
    compute_dtype = _compute_dtype(img.dtype)
    itemsize = jnp.dtype(img.dtype).itemsize
    cbytes = jnp.dtype(compute_dtype).itemsize
    nweight = 1 if buffered_weights else 2

    wh = _bilinear_weight_matrix(out_h, h_in)          # (H_out, H_in) f32
    ww = _bilinear_weight_matrix(out_w, w_in)          # (W_out, W_in) f32

    # ---------------- Path A: tiny planes -> one fused Kronecker matmul.
    kron_bytes = (h_in * w_in) * (out_h * out_w) * cbytes
    if h_in * w_in <= 2048 and out_h * out_w <= 4096 and kron_bytes <= (8 << 20):
        pb, nb = _choose_fused_rows(p, num_cores)
        p_pad = pb * nb
        wk = jnp.kron(wh, ww).T.astype(compute_dtype)  # (Hin*Win, Hout*Wout)

        x = img.reshape(p, h_in * w_in)
        if p_pad != p:
            x = jnp.pad(x, ((0, p_pad - p), (0, 0)))

        need = (2 * pb * (h_in * w_in + out_h * out_w) * itemsize  # dbl-buf IO
                + kron_bytes * nweight                             # weights
                + pb * out_h * out_w * 4)                          # f32 acc

        kernel = functools.partial(_fused_resize_kernel,
                                   compute_dtype=compute_dtype)
        out = pl.pallas_call(
            kernel,
            out_shape=jax.ShapeDtypeStruct((p_pad, out_h * out_w), img.dtype),
            grid_spec=pltpu.PrefetchScalarGridSpec(
                num_scalar_prefetch=0,
                grid=(nb,),
                in_specs=[
                    pl.BlockSpec((pb, h_in * w_in), lambda i: (i, 0)),
                    _weight_spec((h_in * w_in, out_h * out_w),
                                 lambda i: (0, 0), buffered_weights),
                ],
                out_specs=pl.BlockSpec((pb, out_h * out_w), lambda i: (i, 0)),
            ),
            compiler_params=pltpu.CompilerParams(
                dimension_semantics=("parallel",),
                vmem_limit_bytes=_vmem_limit_bytes(need, vmem_cap),
            ),
        )(x, wk)
        return out[:p].reshape(n, c, out_h, out_w)

    # ---------------- Path B: lane-packed planes, two MXU matmuls per step.
    # TODO(synk): for very large planes (>~1.5k^2) add an out_h row-block grid
    # axis (banded h_in index_map) so blocks stay within v7x's 64 MiB VMEM.
    tb, nb = _choose_plane_block(p, w_in, out_w, num_cores, mxu_depth)
    p_pad = tb * nb

    wh_c = wh.astype(compute_dtype)
    # Block-diagonal, pre-transposed width matrix: TB independent planes are
    # resized by one big matmul (zero blocks are cheap MXU tile padding).
    wwd = jnp.kron(jnp.eye(tb, dtype=jnp.float32), ww.T).astype(compute_dtype)

    # Pack TB planes side-by-side along the lane dimension (cheap XLA
    # reshuffle in the wrapper; the kernel needs no cross-lane relayout).
    x = img.reshape(p, h_in, w_in)
    if p_pad != p:
        x = jnp.pad(x, ((0, p_pad - p), (0, 0), (0, 0)))
    x = (x.reshape(nb, tb, h_in, w_in)
          .transpose(0, 2, 1, 3)
          .reshape(nb, h_in, tb * w_in))

    need = (2 * (h_in * tb * w_in + out_h * tb * out_w) * itemsize     # IO blks
            + (out_h * h_in + (tb * w_in) * (tb * out_w)) * cbytes * nweight
            + (out_h * tb * w_in + out_h * tb * out_w) * 4)            # f32 tmp

    kernel = functools.partial(_packed_resize_kernel,
                               compute_dtype=compute_dtype)
    out = pl.pallas_call(
        kernel,
        out_shape=jax.ShapeDtypeStruct((nb, out_h, tb * out_w), img.dtype),
        grid_spec=pltpu.PrefetchScalarGridSpec(
            num_scalar_prefetch=0,
            grid=(nb,),
            in_specs=[
                pl.BlockSpec((1, h_in, tb * w_in), lambda i: (i, 0, 0)),
                _weight_spec((out_h, h_in), lambda i: (0, 0),
                             buffered_weights),
                _weight_spec((tb * w_in, tb * out_w), lambda i: (0, 0),
                             buffered_weights),
            ],
            out_specs=pl.BlockSpec((1, out_h, tb * out_w),
                                   lambda i: (i, 0, 0)),
        ),
        compiler_params=pltpu.CompilerParams(
            dimension_semantics=("parallel",),
            vmem_limit_bytes=_vmem_limit_bytes(need, vmem_cap),
        ),
    )(x, wh_c, wwd)

    # Unpack lanes back to (N, C, H_out, W_out).
    out = (out.reshape(nb, out_h, tb, out_w)
              .transpose(0, 2, 1, 3)
              .reshape(p_pad, out_h, out_w))
    return out[:p].reshape(n, c, out_h, out_w)


_BUFFERED_WEIGHTS_OK = [True]


def _resize(img, out_h: int, out_w: int):
    """Dispatch with a one-shot fallback if single-buffered weight specs are
    rejected by this Pallas build (guarantees the kernel still runs)."""
    try:
        return _bilinear_resize_nchw(img, out_h, out_w,
                                     buffered_weights=_BUFFERED_WEIGHTS_OK[0])
    except Exception:
        if not _BUFFERED_WEIGHTS_OK[0]:
            raise
        _BUFFERED_WEIGHTS_OK[0] = False
        return _bilinear_resize_nchw(img, out_h, out_w,
                                     buffered_weights=False)


class RandomResize:
    """JAX/Pallas port of the PyTorch RandomResize module."""

    def __init__(self, size: int, seed: int = 0):
        self.size = size
        self._rng = np.random.default_rng(seed)

    def __call__(self, img, seed=None):
        # size = torch.randint(self.size - 10, self.size + 10, (1,)).item()
        # Drawn host-side with numpy: the output shape must be static for the
        # Pallas call.  A persistent per-instance Generator gives a fresh size
        # every call; an explicit `seed` makes a call reproducible.
        rng = np.random.default_rng(seed) if seed is not None else self._rng
        size = int(rng.integers(self.size - 10, self.size + 10))
        size = max(size, 1)

        _, _, h, w = img.shape
        # torchvision int-size semantics: resize the SMALLER edge to `size`.
        if w <= h:
            new_w, new_h = size, int(size * h / w)
        else:
            new_h, new_w = size, int(size * w / h)
        return _resize(img, new_h, new_w)


if __name__ == "__main__":
    key = jax.random.PRNGKey(0)

    # Small CIFAR-like input: batch=2, channels=4, spatial=16x16 (NCHW).
    x = jax.random.uniform(key, (2, 4, 16, 16), dtype=jnp.float32)

    module = RandomResize(size=16)
    y = module(x, seed=0)
    y = jax.block_until_ready(y)

    assert y.ndim == 4 and y.shape[:2] == (2, 4)
    assert y.shape[2] == y.shape[3]           # square input -> square output
    assert jnp.all(jnp.isfinite(y))
    print("KERNEL_OK")
</pallas_src>

<mosaic_0001>
module attributes {stable_mosaic.version = 11 : i64} {
  func.func @_fused_resize_kernel(%arg0: i32, %arg1: memref<8x256xf32, #tpu.memory_space<vmem>>, %arg2: memref<256x529xf32, #tpu.memory_space<vmem>>, %arg3: memref<8x529xf32, #tpu.memory_space<vmem>>) attributes {dimension_semantics = [#tpu.dimension_semantics<parallel>], iteration_bounds = array<i64: 1>, scalar_prefetch = 0 : i64, scratch_operands = 0 : i64, tpu.core_type = #tpu.core_type<tc>, window_params = [{transform_indices = @transform_0, window_bounds = array<i64: 8, 256>}, {pipeline_mode = #tpu.pipeline_mode<synchronous>, transform_indices = @transform_1, window_bounds = array<i64: 256, 529>}, {transform_indices = @transform_2, window_bounds = array<i64: 8, 529>}]} {
    %c0 = arith.constant 0 : index
    %c0_0 = arith.constant 0 : index
    %0 = vector.load %arg1[%c0, %c0_0] : memref<8x256xf32, #tpu.memory_space<vmem>>, vector<8x256xf32>
    %c0_1 = arith.constant 0 : index
    %c0_2 = arith.constant 0 : index
    %1 = vector.load %arg2[%c0_1, %c0_2] : memref<256x529xf32, #tpu.memory_space<vmem>>, vector<256x529xf32>
    %cst = arith.constant dense<0.000000e+00> : vector<8x529xf32>
    %2 = tpu.matmul %0, %1, %cst {dimension_numbers = #tpu.dot_dimension_numbers<[1], [0], [0], [1], [0, 0, 1, 1], [], []>} : vector<8x256xf32>, vector<256x529xf32>, vector<8x529xf32> -> vector<8x529xf32>
    %c0_3 = arith.constant 0 : index
    %c0_4 = arith.constant 0 : index
    %3 = vector.load %arg3[%c0_3, %c0_4] : memref<8x529xf32, #tpu.memory_space<vmem>>, vector<8x529xf32>
    tpu.vector_store %arg3[%c0_3, %c0_4], %2 {strides = array<i32>} : memref<8x529xf32, #tpu.memory_space<vmem>>, vector<8x529xf32>,
    return
  }
  func.func @transform_0(%arg0: i32) -> (i32, i32) {
    %c0_i32 = arith.constant 0 : i32
    %c0_i32_0 = arith.constant 0 : i32
    return %arg0, %c0_i32 : i32, i32
  }
  func.func @transform_1(%arg0: i32) -> (i32, i32) {
    %c0_i32 = arith.constant 0 : i32
    %c0_i32_0 = arith.constant 0 : i32
    %c0_i32_1 = arith.constant 0 : i32
    return %c0_i32, %c0_i32_0 : i32, i32
  }
  func.func @transform_2(%arg0: i32) -> (i32, i32) {
    %c0_i32 = arith.constant 0 : i32
    %c0_i32_0 = arith.constant 0 : i32
    return %arg0, %c0_i32 : i32, i32
  }
}

module attributes {stable_mosaic.version = 11 : i64} {
  func.func @_fused_resize_kernel(%arg0: i32, %arg1: memref<8x256xf32, #tpu.memory_space<vmem>>, %arg2: memref<256x529xf32, #tpu.memory_space<vmem>>, %arg3: memref<8x529xf32, #tpu.memory_space<vmem>>) attributes {dimension_semantics = [#tpu.dimension_semantics<parallel>], iteration_bounds = array<i64: 1>, scalar_prefetch = 0 : i64, scratch_operands = 0 : i64, tpu.core_type = #tpu.core_type<tc>, window_params = [{transform_indices = @transform_0, window_bounds = array<i64: 8, 256>}, {pipeline_mode = #tpu.pipeline_mode<synchronous>, transform_indices = @transform_1, window_bounds = array<i64: 256, 529>}, {transform_indices = @transform_2, window_bounds = array<i64: 8, 529>}]} {
    %c0 = arith.constant 0 : index
    %c0_0 = arith.constant 0 : index
    %0 = vector.load %arg1[%c0, %c0_0] : memref<8x256xf32, #tpu.memory_space<vmem>>, vector<8x256xf32>
    %c0_1 = arith.constant 0 : index
    %c0_2 = arith.constant 0 : index
    %1 = vector.load %arg2[%c0_1, %c0_2] : memref<256x529xf32, #tpu.memory_space<vmem>>, vector<256x529xf32>
    %cst = arith.constant dense<0.000000e+00> : vector<8x529xf32>
    %2 = tpu.matmul %0, %1, %cst {dimension_numbers = #tpu.dot_dimension_numbers<[1], [0], [0], [1], [0, 0, 1, 1], [], []>} : vector<8x256xf32>, vector<256x529xf32>, vector<8x529xf32> -> vector<8x529xf32>
    %c0_3 = arith.constant 0 : index
    %c0_4 = arith.constant 0 : index
    %3 = vector.load %arg3[%c0_3, %c0_4] : memref<8x529xf32, #tpu.memory_space<vmem>>, vector<8x529xf32>
    tpu.vector_store %arg3[%c0_3, %c0_4], %2 {strides = array<i32>} : memref<8x529xf32, #tpu.memory_space<vmem>>, vector<8x529xf32>,
    return
  }
  func.func @transform_0(%arg0: i32) -> (i32, i32) {
    %c0_i32 = arith.constant 0 : i32
    %c0_i32_0 = arith.constant 0 : i32
    return %arg0, %c0_i32 : i32, i32
  }
  func.func @transform_1(%arg0: i32) -> (i32, i32) {
    %c0_i32 = arith.constant 0 : i32
    %c0_i32_0 = arith.constant 0 : i32
    %c0_i32_1 = arith.constant 0 : i32
    return %c0_i32, %c0_i32_0 : i32, i32
  }
  func.func @transform_2(%arg0: i32) -> (i32, i32) {
    %c0_i32 = arith.constant 0 : i32
    %c0_i32_0 = arith.constant 0 : i32
    return %arg0, %c0_i32 : i32, i32
  }
}

</mosaic_0001>

<bundles_post_ra>
// kernel: _bilinear_resize_nchw.1
= control target key start
LH: loop header
LB: loop body
LE: loop exit
PB: predicated region body
PF: predicated region fallthrough
CT: control target
= control target key end

     0   :  { %vm389_vm0 = vcmask 138240   ;;  %s956_s1 = inlined_call_operand.vmem [shape: f32[256,529], index: 1, kind: input, shape index: {}]   ;;  %s957_s0 = inlined_call_operand.vmem [shape: f32[8,256], index: 0, kind: input, shape index: {}]   ;;  %s958_s2 = inlined_call_operand.vmem [shape: f32[8,529], index: 2, kind: output, shape index: {}]  }
   0x1   :  { %v89_v0 = vld [vmem:[%s956_s1 + $0x260] sm:$0xff]  ;;  %v88_v1 = vld [vmem:[%s956_s1 + $0x258] sm:$0xff]  ;;  %v83_v3 = vld [vmem:[%s956_s1 + $0x230] sm:$0xff] }
   0x2   :  { %v84_v2 = vld [vmem:[%s956_s1 + $0x238] sm:$0xff]  ;;  %173 = vmatprep.subr.mxu0 %v89_v0  ;;  %v79_v4 = vld [vmem:[%s956_s1 + $0x210] sm:$0xff]  ;;  %v78_v5 = vld [vmem:[%s956_s1 + $0x208] sm:$0xff] }
   0x3   :  { %174 = vmatpush1.msra.mxu0 %v88_v1  ;;  %v74_v6 = vld [vmem:[%s956_s1 + $0x1e8] sm:$0xff]  ;;  %v73_v7 = vld [vmem:[%s956_s1 + $0x1e0] sm:$0xff]  ;;  %v68_v9 = vld [vmem:[%s956_s1 + $0x1b8] sm:$0xff] }
   0x4   :  { %175 = vmatprep.subr.mxu0 %v84_v2  ;;  %v69_v8 = vld [vmem:[%s956_s1 + $0x1c0] sm:$0xff]  ;;  %v64_v10 = vld [vmem:[%s956_s1 + $0x198] sm:$0xff]  ;;  %v63_v11 = vld [vmem:[%s956_s1 + $0x190] sm:$0xff] }
   0x5   :  { %176 = vmatpush1.msra.mxu0 %v83_v3  ;;  %v59_v12 = vld [vmem:[%s956_s1 + $0x170] sm:$0xff]  ;;  %v58_v13 = vld [vmem:[%s956_s1 + $0x168] sm:$0xff]  ;;  %v53_v18 = vld [vmem:[%s956_s1 + $0x140] sm:$0xff] }
   0x6   :  { %177 = vmatprep.subr.mxu0 %v79_v4  ;;  %v91_v14 = vld [vmem:[%s956_s1 + $0x270] sm:$0xff]  ;;  %v90_v15 = vld [vmem:[%s956_s1 + $0x268] sm:$0xff]  ;;  %v85_v19 = vld [vmem:[%s956_s1 + $0x240] sm:$0xff] }
   0x7   :  { %178 = vmatpush1.msra.mxu0 %v78_v5  ;;  %v54_v16 = vld [vmem:[%s956_s1 + $0x148] sm:$0xff]  ;;  %244 = vmatprep.subr.mxu1 %v91_v14  ;;  %v81_v20 = vld [vmem:[%s956_s1 + $0x220] sm:$0xff]  ;;  %v80_v22 = vld [vmem:[%s956_s1 + $0x218] sm:$0xff] }
   0x8   :  { %179 = vmatprep.subr.mxu0 %v74_v6  ;;  %v86_v17 = vld [vmem:[%s956_s1 + $0x248] sm:$0xff]  ;;  %245 = vmatpush1.msra.mxu1 %v90_v15  ;;  %v49_v21 = vld [vmem:[%s956_s1 + $0x120] sm:$0xff]  ;;  %v48_v23 = vld [vmem:[%s956_s1 + $0x118] sm:$0xff] }
   0x9   :  { %180 = vmatpush1.msra.mxu0 %v73_v7  ;;  %246 = vmatprep.subr.mxu1 %v86_v17  ;;  %v76_v24 = vld [vmem:[%s956_s1 + $0x1f8] sm:$0xff]  ;;  %v75_v26 = vld [vmem:[%s956_s1 + $0x1f0] sm:$0xff]  ;;  %v70_v30 = vld [vmem:[%s956_s1 + $0x1c8] sm:$0xff] }
   0xa   :  { %181 = vmatprep.subr.mxu0 %v69_v8  ;;  %247 = vmatpush1.msra.mxu1 %v85_v19  ;;  %v44_v25 = vld [vmem:[%s956_s1 + $0xf8] sm:$0xff]  ;;  %v43_v27 = vld [vmem:[%s956_s1 + $0xf0] sm:$0xff]  ;;  %v38_v31 = vld [vmem:[%s956_s1 + $0xc8] sm:$0xff] }
   0xb   :  { %182 = vmatpush1.msra.mxu0 %v68_v9  ;;  %248 = vmatprep.subr.mxu1 %v81_v20  ;;  %v71_v28 = vld [vmem:[%s956_s1 + $0x1d0] sm:$0xff]  ;;  %v66_v32 = vld [vmem:[%s956_s1 + $0x1a8] sm:$0xff]  ;;  %v65_v34 = vld [vmem:[%s956_s1 + $0x1a0] sm:$0xff] }
   0xc   :  { %183 = vmatprep.subr.mxu0 %v64_v10  ;;  %249 = vmatpush1.msra.mxu1 %v80_v22  ;;  %v39_v29 = vld [vmem:[%s956_s1 + $0xd0] sm:$0xff]  ;;  %v34_v33 = vld [vmem:[%s956_s1 + $0xa8] sm:$0xff]  ;;  %v33_v35 = vld [vmem:[%s956_s1 + $0xa0] sm:$0xff] }
   0xd   :  { %184 = vmatpush1.msra.mxu0 %v63_v11  ;;  %250 = vmatprep.subr.mxu1 %v76_v24  ;;  %v61_v36 = vld [vmem:[%s956_s1 + $0x180] sm:$0xff]  ;;  %v60_v38 = vld [vmem:[%s956_s1 + $0x178] sm:$0xff]  ;;  %v55_v42 = vld [vmem:[%s956_s1 + $0x150] sm:$0xff] }
   0xe   :  { %185 = vmatprep.subr.mxu0 %v59_v12  ;;  %251 = vmatpush1.msra.mxu1 %v75_v26  ;;  %v29_v37 = vld [vmem:[%s956_s1 + $0x80] sm:$0xff]  ;;  %v28_v39 = vld [vmem:[%s956_s1 + $0x78] sm:$0xff]  ;;  %v23_v43 = vld [vmem:[%s956_s1 + $0x50] sm:$0xff] }
   0xf   :  { %186 = vmatpush1.msra.mxu0 %v58_v13  ;;  %252 = vmatprep.subr.mxu1 %v71_v28  ;;  %v56_v40 = vld [vmem:[%s956_s1 + $0x158] sm:$0xff]  ;;  %v51_v44 = vld [vmem:[%s956_s1 + $0x130] sm:$0xff]  ;;  %v50_v46 = vld [vmem:[%s956_s1 + $0x128] sm:$0xff] }
  0x10   :  { %187 = vmatprep.subr.mxu0 %v54_v16  ;;  %253 = vmatpush1.msra.mxu1 %v70_v30  ;;  %v24_v41 = vld [vmem:[%s956_s1 + $0x58] sm:$0xff]  ;;  %v19_v45 = vld [vmem:[%s956_s1 + $0x30] sm:$0xff]  ;;  %v18_v47 = vld [vmem:[%s956_s1 + $0x28] sm:$0xff] }
  0x11   :  { %188 = vmatpush1.msra.mxu0 %v53_v18  ;;  %254 = vmatprep.subr.mxu1 %v66_v32  ;;  %v46_v48 = vld [vmem:[%s956_s1 + $0x108] sm:$0xff]  ;;  %v45_v50 = vld [vmem:[%s956_s1 + $0x100] sm:$0xff]  ;;  %v40_v54 = vld [vmem:[%s956_s1 + $0xd8] sm:$0xff] }
  0x12   :  { %189 = vmatprep.subr.mxu0 %v49_v21  ;;  %255 = vmatpush1.msra.mxu1 %v65_v34  ;;  %v14_v49 = vld [vmem:[%s956_s1 + $0x8] sm:$0xff]  ;;  %v13_v51 = vld [vmem:[%s956_s1] sm:$0xff]  ;;  %v168_v55 = vld [vmem:[%s956_s1 + $0x4d8] sm:$0xff] }
  0x13   :  { %190 = vmatpush1.msra.mxu0 %v48_v23  ;;  %256 = vmatprep.subr.mxu1 %v61_v36  ;;  %v41_v52 = vld [vmem:[%s956_s1 + $0xe0] sm:$0xff]  ;;  %v36_v56 = vld [vmem:[%s956_s1 + $0xb8] sm:$0xff]  ;;  %v35_v58 = vld [vmem:[%s956_s1 + $0xb0] sm:$0xff] }
  0x14   :  { %191 = vmatprep.subr.mxu0 %v44_v25  ;;  %257 = vmatpush1.msra.mxu1 %v60_v38  ;;  %v169_v53 = vld [vmem:[%s956_s1 + $0x4e0] sm:$0xff]  ;;  %v164_v57 = vld [vmem:[%s956_s1 + $0x4b8] sm:$0xff]  ;;  %v163_v59 = vld [vmem:[%s956_s1 + $0x4b0] sm:$0xff] }
  0x15   :  { %192 = vmatpush1.msra.mxu0 %v43_v27  ;;  %258 = vmatprep.subr.mxu1 %v56_v40  ;;  %v31_v60 = vld [vmem:[%s956_s1 + $0x90] sm:$0xff]  ;;  %v30_v62 = vld [vmem:[%s956_s1 + $0x88] sm:$0xff]  ;;  %v25_v2 = vld [vmem:[%s956_s1 + $0x60] sm:$0xff] }
  0x16   :  { %193 = vmatprep.subr.mxu0 %v39_v29  ;;  %259 = vmatpush1.msra.mxu1 %v55_v42  ;;  %v159_v61 = vld [vmem:[%s956_s1 + $0x490] sm:$0xff]  ;;  %v158_v63 = vld [vmem:[%s956_s1 + $0x488] sm:$0xff]  ;;  %v153_v3 = vld [vmem:[%s956_s1 + $0x460] sm:$0xff] }
  0x17   :  { %194 = vmatpush1.msra.mxu0 %v38_v31  ;;  %260 = vmatprep.subr.mxu1 %v51_v44  ;;  %v26_v0 = vld [vmem:[%s956_s1 + $0x68] sm:$0xff]  ;;  %v21_v4 = vld [vmem:[%s956_s1 + $0x40] sm:$0xff]  ;;  %v20_v6 = vld [vmem:[%s956_s1 + $0x38] sm:$0xff] }
  0x18   :  { %195 = vmatprep.subr.mxu0 %v34_v33  ;;  %261 = vmatpush1.msra.mxu1 %v50_v46  ;;  %v154_v1 = vld [vmem:[%s956_s1 + $0x468] sm:$0xff]  ;;  %v149_v5 = vld [vmem:[%s956_s1 + $0x440] sm:$0xff]  ;;  %v148_v7 = vld [vmem:[%s956_s1 + $0x438] sm:$0xff] }
  0x19   :  { %196 = vmatpush1.msra.mxu0 %v33_v35  ;;  %262 = vmatprep.subr.mxu1 %v46_v48  ;;  %v16_v8 = vld [vmem:[%s956_s1 + $0x18] sm:$0xff]  ;;  %v670_v10 = vld [vmem:[%s957_s0 + $0x8] sm:$0xff]  ;;  %v143_v11 = vld [vmem:[%s956_s1 + $0x410] sm:$0xff] }
  0x1a   :  { %197 = vmatprep.subr.mxu0 %v29_v37  ;;  %263 = vmatpush1.msra.mxu1 %v45_v50  ;;  %v144_v9 = vld [vmem:[%s956_s1 + $0x418] sm:$0xff]  ;;  %v15_v12 = vld [vmem:[%s956_s1 + $0x10] sm:$0xff]  ;;  %v138_v15 = vld [vmem:[%s956_s1 + $0x3e8] sm:$0xff] }
  0x1b   :  { %198 = vmatpush1.msra.mxu0 %v28_v39  ;;  %264 = vmatprep.subr.mxu1 %v41_v52  ;;  %v139_v13 = vld [vmem:[%s956_s1 + $0x3f0] sm:$0xff]  ;;  %v170_v16 = vld [vmem:[%s956_s1 + $0x4e8] sm:$0xff]  ;;  %v133_v19 = vld [vmem:[%s956_s1 + $0x3c0] sm:$0xff] }
  0x1c   :  { %199 = vmatprep.subr.mxu0 %v24_v41  ;;  %265 = vmatpush1.msra.mxu1 %v40_v54  ;;  %v171_v14 = vld [vmem:[%s956_s1 + $0x4f0] sm:$0xff]  ;;  %v134_v17 = vld [vmem:[%s956_s1 + $0x3c8] sm:$0xff]  ;;  %v165_v20 = vld [vmem:[%s956_s1 + $0x4c0] sm:$0xff] }
  0x1d   :  { %200 = vmatpush1.msra.mxu0 %v23_v43  ;;  %266 = vmatprep.subr.mxu1 %v36_v56  ;;  %v166_v18 = vld [vmem:[%s956_s1 + $0x4c8] sm:$0xff]  ;;  %v129_v21 = vld [vmem:[%s956_s1 + $0x3a0] sm:$0xff]  ;;  %v128_v23 = vld [vmem:[%s956_s1 + $0x398] sm:$0xff] }
  0x1e   :  { %201 = vmatprep.subr.mxu0 %v19_v45  ;;  %267 = vmatpush1.msra.mxu1 %v35_v58  ;;  %v161_v22 = vld [vmem:[%s956_s1 + $0x4a0] sm:$0xff]  ;;  %v160_v24 = vld [vmem:[%s956_s1 + $0x498] sm:$0xff]  ;;  %v123_v27 = vld [vmem:[%s956_s1 + $0x370] sm:$0xff] }
  0x1f   :  { %202 = vmatpush1.msra.mxu0 %v18_v47  ;;  %268 = vmatprep.subr.mxu1 %v31_v60  ;;  %v124_v25 = vld [vmem:[%s956_s1 + $0x378] sm:$0xff]  ;;  %v155_v28 = vld [vmem:[%s956_s1 + $0x470] sm:$0xff]  ;;  %v118_v31 = vld [vmem:[%s956_s1 + $0x348] sm:$0xff] }
  0x20   :  { %203 = vmatprep.subr.mxu0 %v14_v49  ;;  %269 = vmatpush1.msra.mxu1 %v30_v62  ;;  %v156_v26 = vld [vmem:[%s956_s1 + $0x478] sm:$0xff]  ;;  %v119_v29 = vld [vmem:[%s956_s1 + $0x350] sm:$0xff]  ;;  %v150_v32 = vld [vmem:[%s956_s1 + $0x448] sm:$0xff] }
  0x21   :  { %204 = vmatpush1.msra.mxu0 %v13_v51  ;;  %270 = vmatprep.subr.mxu1 %v26_v0  ;;  %v151_v30 = vld [vmem:[%s956_s1 + $0x450] sm:$0xff]  ;;  %v114_v33 = vld [vmem:[%s956_s1 + $0x328] sm:$0xff]  ;;  %v113_v35 = vld [vmem:[%s956_s1 + $0x320] sm:$0xff] }
  0x22   :  { %205 = vmatprep.subr.mxu0 %v169_v53  ;;  %271 = vmatpush1.msra.mxu1 %v25_v2  ;;  %v146_v34 = vld [vmem:[%s956_s1 + $0x428] sm:$0xff]  ;;  %v145_v36 = vld [vmem:[%s956_s1 + $0x420] sm:$0xff]  ;;  %v108_v39 = vld [vmem:[%s956_s1 + $0x2f8] sm:$0xff] }
  0x23   :  { %206 = vmatpush2.msra.mxu0 %v168_v55  ;;  %272 = vmatprep.subr.mxu1 %v21_v4  ;;  %v109_v37 = vld [vmem:[%s956_s1 + $0x300] sm:$0xff]  ;;  %v140_v40 = vld [vmem:[%s956_s1 + $0x3f8] sm:$0xff]  ;;  %v103_v43 = vld [vmem:[%s956_s1 + $0x2d0] sm:$0xff] }
  0x24   :  { %207 = vmatprep.subr.mxu0 %v164_v57  ;;  %273 = vmatpush1.msra.mxu1 %v20_v6  ;;  %v141_v38 = vld [vmem:[%s956_s1 + $0x400] sm:$0xff]  ;;  %v104_v41 = vld [vmem:[%s956_s1 + $0x2d8] sm:$0xff]  ;;  %v135_v44 = vld [vmem:[%s956_s1 + $0x3d0] sm:$0xff] }
  0x25   :  { %208 = vmatpush2.msra.mxu0 %v163_v59  ;;  %274 = vmatprep.subr.mxu1 %v16_v8  ;;  %v136_v42 = vld [vmem:[%s956_s1 + $0x3d8] sm:$0xff]  ;;  %v99_v45 = vld [vmem:[%s956_s1 + $0x2b0] sm:$0xff]  ;;  %v98_v47 = vld [vmem:[%s956_s1 + $0x2a8] sm:$0xff] }
  0x26   :  { %209 = vmatprep.subr.mxu0 %v159_v61  ;;  %237 = vmatprep.mubr.f32.mxu0 %v670_v10  ;;  %v131_v46 = vld [vmem:[%s956_s1 + $0x3b0] sm:$0xff]  ;;  %v130_v48 = vld [vmem:[%s956_s1 + $0x3a8] sm:$0xff]  ;;  %v93_v51 = vld [vmem:[%s956_s1 + $0x280] sm:$0xff] }
  0x27   :  { %210 = vmatpush2.msra.mxu0 %v158_v63  ;;  %275 = vmatpush1.msra.mxu1 %v15_v12  ;;  %v94_v49 = vld [vmem:[%s956_s1 + $0x288] sm:$0xff]  ;;  %v125_v52 = vld [vmem:[%s956_s1 + $0x380] sm:$0xff]  ;;  %v172_v54 = vld [vmem:[%s956_s1 + $0x4f8] sm:$0xff] }
  0x28   :  { %211 = vmatprep.subr.mxu0 %v154_v1  ;;  %276 = vmatprep.subr.mxu1 %v171_v14  ;;  %v126_v50 = vld [vmem:[%s956_s1 + $0x388] sm:$0xff]  ;;  %v802_v53 = vld [vmem:[%s957_s0] sm:$0xff]  ;;  %v92_v55 = vld [vmem:[%s956_s1 + $0x278] sm:$0xff] }
  0x29   :  { %212 = vmatpush2.msra.mxu0 %v153_v3  ;;  %277 = vmatpush2.msra.mxu1 %v170_v16  ;;  %v121_v56 = vld [vmem:[%s956_s1 + $0x360] sm:$0xff]  ;;  %v167_v57 = vld [vmem:[%s956_s1 + $0x4d0] sm:$0xff]  ;;  %v120_v58 = vld [vmem:[%s956_s1 + $0x358] sm:$0xff] }
  0x2a   :  { %213 = vmatprep.subr.mxu0 %v149_v5  ;;  %278 = vmatprep.subr.mxu1 %v166_v18  ;;  %v87_v59 = vld [vmem:[%s956_s1 + $0x250] sm:$0xff]  ;;  %v116_v60 = vld [vmem:[%s956_s1 + $0x338] sm:$0xff]  ;;  %v162_v61 = vld [vmem:[%s956_s1 + $0x4a8] sm:$0xff] }
  0x2b   :  { %214 = vmatpush2.msra.mxu0 %v148_v7  ;;  %279 = vmatpush2.msra.mxu1 %v165_v20  ;;  %v115_v62 = vld [vmem:[%s956_s1 + $0x330] sm:$0xff]  ;;  %v82_v63 = vld [vmem:[%s956_s1 + $0x228] sm:$0xff]  ;;  %v157_v1 = vld [vmem:[%s956_s1 + $0x480] sm:$0xff] }
  0x2c   :  { %215 = vmatprep.subr.mxu0 %v144_v9  ;;  %280 = vmatprep.subr.mxu1 %v161_v22  ;;  %v111_v0 = vld [vmem:[%s956_s1 + $0x310] sm:$0xff]  ;;  %v110_v2 = vld [vmem:[%s956_s1 + $0x308] sm:$0xff]  ;;  %v77_v3 = vld [vmem:[%s956_s1 + $0x200] sm:$0xff] }
  0x2d   :  { %216 = vmatpush2.msra.mxu0 %v143_v11  ;;  %281 = vmatpush2.msra.mxu1 %v160_v24  ;;  %v106_v4 = vld [vmem:[%s956_s1 + $0x2e8] sm:$0xff]  ;;  %v152_v5 = vld [vmem:[%s956_s1 + $0x458] sm:$0xff]  ;;  %v105_v6 = vld [vmem:[%s956_s1 + $0x2e0] sm:$0xff] }
  0x2e   :  { %217 = vmatprep.subr.mxu0 %v139_v13  ;;  %282 = vmatprep.subr.mxu1 %v156_v26  ;;  %v72_v7 = vld [vmem:[%s956_s1 + $0x1d8] sm:$0xff]  ;;  %v101_v8 = vld [vmem:[%s956_s1 + $0x2c0] sm:$0xff]  ;;  %v147_v9 = vld [vmem:[%s956_s1 + $0x430] sm:$0xff] }
  0x2f   :  { %218 = vmatpush2.msra.mxu0 %v138_v15  ;;  %283 = vmatpush2.msra.mxu1 %v155_v28  ;;  %v100_v11 = vld [vmem:[%s956_s1 + $0x2b8] sm:$0xff]  ;;  %v67_v12 = vld [vmem:[%s956_s1 + $0x1b0] sm:$0xff]  ;;  %v142_v14 = vld [vmem:[%s956_s1 + $0x408] sm:$0xff] }
  0x30   :  { %219 = vmatprep.subr.mxu0 %v134_v17  ;;  %284 = vmatprep.subr.mxu1 %v151_v30  ;;  %v96_v13 = vld [vmem:[%s956_s1 + $0x298] sm:$0xff]  ;;  %v95_v15 = vld [vmem:[%s956_s1 + $0x290] sm:$0xff]  ;;  %v62_v16 = vld [vmem:[%s956_s1 + $0x188] sm:$0xff] }
  0x31   :  { %220 = vmatpush2.msra.mxu0 %v133_v19  ;;  %285 = vmatpush2.msra.mxu1 %v150_v32  ;;  %v137_v17 = vld [vmem:[%s956_s1 + $0x3e0] sm:$0xff]  ;;  %v132_v19 = vld [vmem:[%s956_s1 + $0x3b8] sm:$0xff]  ;;  %v47_v22 = vld [vmem:[%s956_s1 + $0x110] sm:$0xff] }
  0x32   :  { %221 = vmatprep.subr.mxu0 %v129_v21  ;;  %286 = vmatprep.subr.mxu1 %v146_v34  ;;  %v57_v18 = vld [vmem:[%s956_s1 + $0x160] sm:$0xff]  ;;  %v52_v20 = vld [vmem:[%s956_s1 + $0x138] sm:$0xff]  ;;  %v127_v21 = vld [vmem:[%s956_s1 + $0x390] sm:$0xff] }
  0x33   :  { %222 = vmatpush2.msra.mxu0 %v128_v23  ;;  %287 = vmatpush2.msra.mxu1 %v145_v36  ;;  %v122_v23 = vld [vmem:[%s956_s1 + $0x368] sm:$0xff]  ;;  %v117_v24 = vld [vmem:[%s956_s1 + $0x340] sm:$0xff]  ;;  %v112_v26 = vld [vmem:[%s956_s1 + $0x318] sm:$0xff] }
  0x34   :  { %223 = vmatprep.subr.mxu0 %v124_v25  ;;  %288 = vmatprep.subr.mxu1 %v141_v38  ;;  %v37_v25 = vld [vmem:[%s956_s1 + $0xc0] sm:$0xff]  ;;  %v107_v28 = vld [vmem:[%s956_s1 + $0x2f0] sm:$0xff]  ;;  %v102_v30 = vld [vmem:[%s956_s1 + $0x2c8] sm:$0xff] }
  0x35   :  { %224 = vmatpush2.msra.mxu0 %v123_v27  ;;  %289 = vmatpush2.msra.mxu1 %v140_v40  ;;  %v32_v27 = vld [vmem:[%s956_s1 + $0x98] sm:$0xff]  ;;  %v97_v32 = vld [vmem:[%s956_s1 + $0x2a0] sm:$0xff] }
  0x36   :  { %225 = vmatprep.subr.mxu0 %v119_v29  ;;  %290 = vmatprep.subr.mxu1 %v136_v42  ;;  %v27_v29 = vld [vmem:[%s956_s1 + $0x70] sm:$0xff] }
  0x37   :  { %226 = vmatpush2.msra.mxu0 %v118_v31  ;;  %291 = vmatpush2.msra.mxu1 %v135_v44  ;;  %v22_v31 = vld [vmem:[%s956_s1 + $0x48] sm:$0xff] }
  0x38   :  { %227 = vmatprep.subr.mxu0 %v114_v33  ;;  %292 = vmatprep.subr.mxu1 %v131_v46  ;;  %v17_v33 = vld [vmem:[%s956_s1 + $0x20] sm:$0xff] }
  0x39   :  { %228 = vmatpush2.msra.mxu0 %v113_v35  ;;  %293 = vmatpush2.msra.mxu1 %v130_v48 }
  0x3a   :  { %229 = vmatprep.subr.mxu0 %v109_v37  ;;  %294 = vmatprep.subr.mxu1 %v126_v50 }
  0x3b   :  { %230 = vmatpush2.msra.mxu0 %v108_v39  ;;  %295 = vmatpush2.msra.mxu1 %v125_v52 }
  0x3c   :  { %231 = vmatprep.subr.mxu0 %v104_v41  ;;  %296 = vmatprep.subr.mxu1 %v121_v56 }
  0x3d   :  { %232 = vmatpush2.msra.mxu0 %v103_v43  ;;  %297 = vmatpush2.msra.mxu1 %v120_v58 }
  0x3e   :  { %233 = vmatprep.subr.mxu0 %v99_v45  ;;  %298 = vmatprep.subr.mxu1 %v116_v60 }
  0x3f   :  { %234 = vmatpush2.msra.mxu0 %v98_v47  ;;  %299 = vmatpush2.msra.mxu1 %v115_v62 }
  0x40   :  { %235 = vmatprep.subr.mxu0 %v94_v49  ;;  %300 = vmatprep.subr.mxu1 %v111_v0 }
  0x41   :  { %236 = vmatpush2.msra.mxu0 %v93_v51  ;;  %301 = vmatpush2.msra.mxu1 %v110_v2 }
  0x42   :  { %238 = vmatmul.mubr.f32.vlgmr.msra.gmra.mxu0 %v802_v53  ;;  %395 = vmatprep.subr.mxu0 %v172_v54 }
  0x43   :  { %396 = vmatpush3.msra.mxu0 %v92_v55  ;;  %302 = vmatprep.subr.mxu1 %v106_v4 }
  0x44   :  { %397 = vmatprep.subr.mxu0 %v167_v57  ;;  %303 = vmatpush2.msra.mxu1 %v105_v6 }
  0x45   :  { %398 = vmatpush3.msra.mxu0 %v87_v59  ;;  %304 = vmatprep.subr.mxu1 %v101_v8 }
  0x46   :  { %399 = vmatprep.subr.mxu0 %v162_v61  ;;  %305 = vmatpush2.msra.mxu1 %v100_v11 }
  0x47   :  { %400 = vmatpush3.msra.mxu0 %v82_v63  ;;  %306 = vmatprep.subr.mxu1 %v96_v13 }
  0x48   :  { %401 = vmatprep.subr.mxu0 %v157_v1  ;;  %307 = vmatpush2.msra.mxu1 %v95_v15 }
  0x49   :  { %402 = vmatpush3.msra.mxu0 %v77_v3  ;;  %308 = vmatprep.mubr.f32.mxu1 %v670_v10 }
  0x4a   :  { %403 = vmatprep.subr.mxu0 %v152_v5  ;;  %379 = vmatprep.mubr.f32.mxu0 %v670_v10  ;;  %v42_v10 = vld [vmem:[%s956_s1 + $0xe8] sm:$0xff] }
  0x4b   :  { %404 = vmatpush3.msra.mxu0 %v72_v7  ;;  %309 = vmatmul.mubr.f32.vlgmr.msra.gmra.mxu1 %v802_v53 }
  0x4c   :  { %405 = vmatprep.subr.mxu0 %v147_v9 }
  0x4d   :  { %406 = vmatpush3.msra.mxu0 %v67_v12 }
  0x4e   :  { %407 = vmatprep.subr.mxu0 %v142_v14 }
  0x4f   :  { %408 = vmatpush3.msra.mxu0 %v62_v16 }
  0x50   :  { %409 = vmatprep.subr.mxu0 %v137_v17 }
  0x51   :  { %410 = vmatpush3.msra.mxu0 %v57_v18 }
  0x52   :  { %411 = vmatprep.subr.mxu0 %v132_v19 }
  0x53   :  { %412 = vmatpush3.msra.mxu0 %v52_v20 }
  0x54   :  { %413 = vmatprep.subr.mxu0 %v127_v21 }
  0x55   :  { %414 = vmatpush3.msra.mxu0 %v47_v22 }
  0x56   :  { %415 = vmatprep.subr.mxu0 %v122_v23 }
  0x57   :  { %416 = vmatpush3.msra.mxu0 %v42_v10 }
  0x58   :  { %417 = vmatprep.subr.mxu0 %v117_v24 }
  0x59   :  { %418 = vmatpush3.msra.mxu0 %v37_v25 }
  0x5a   :  { %419 = vmatprep.subr.mxu0 %v112_v26 }
  0x5b   :  { %420 = vmatpush3.msra.mxu0 %v32_v27 }
  0x5c   :  { %421 = vmatprep.subr.mxu0 %v107_v28 }
  0x5d   :  { %422 = vmatpush3.msra.mxu0 %v27_v29 }
  0x5e   :  { %423 = vmatprep.subr.mxu0 %v102_v30 }
  0x5f   :  { %424 = vmatpush3.msra.mxu0 %v22_v31 }
  0x60   :  { %425 = vmatprep.subr.mxu0 %v97_v32 }
  0x61   :  { %426 = vmatpush3.msra.mxu0 %v17_v33 }
  0x62   :  { %380 = vmatmul.mubr.f32.vlgmr.msra.gmra.mxu0 %v802_v53 }
 0x102   :  { %v239_v34 = vpop.f32.mrf.mxu0 }
 0x103   :  { %385 = vst [vmem:[%s958_s2] sm:$0xff] %v239_v34 }
 0x104   :  { %v241_v35 = vpop.f32.mrf.mxu0 }
 0x105   :  { %386 = vst [vmem:[%s958_s2 + $0x8] sm:$0xff] %v241_v35 }
 0x10b   :  { %v310_v36 = vpop.f32.mrf.mxu1 }
 0x10c   :  { %387 = vst [vmem:[%s958_s2 + $0x10] sm:$0xff] %v310_v36 }
 0x10d   :  { %v312_v37 = vpop.f32.mrf.mxu1 }
 0x10e   :  { %388 = vst [vmem:[%s958_s2 + $0x18] sm:$0xff] %v312_v37 }
 0x122   :  { %v427_v38 = vpop.f32.mrf.mxu0 }
 0x124   :  { %v428_v39 = vpop.f32.mrf.mxu0 }
 0x125   :  { %v429_v40 = vadd.f32 %v428_v39, %v427_v38 }
 0x127   :  { %390 = vst.msk [vmem:[%s958_s2 + $0x20] sm:$0xff] %vm389_vm0, %v429_v40 }

// kernel: _bilinear_resize_nchw.1
= control target key start
LH: loop header
LB: loop body
LE: loop exit
PB: predicated region body
PF: predicated region fallthrough
CT: control target
= control target key end

     0   :  { %vm389_vm0 = vcmask 138240   ;;  %s956_s1 = inlined_call_operand.vmem [shape: f32[256,529], index: 1, kind: input, shape index: {}]   ;;  %s957_s0 = inlined_call_operand.vmem [shape: f32[8,256], index: 0, kind: input, shape index: {}]   ;;  %s958_s2 = inlined_call_operand.vmem [shape: f32[8,529], index: 2, kind: output, shape index: {}]  }
   0x1   :  { %v89_v0 = vld [vmem:[%s956_s1 + $0x260] sm:$0xff]  ;;  %v88_v1 = vld [vmem:[%s956_s1 + $0x258] sm:$0xff]  ;;  %v83_v3 = vld [vmem:[%s956_s1 + $0x230] sm:$0xff] }
   0x2   :  { %v84_v2 = vld [vmem:[%s956_s1 + $0x238] sm:$0xff]  ;;  %173 = vmatprep.subr.mxu0 %v89_v0  ;;  %v79_v4 = vld [vmem:[%s956_s1 + $0x210] sm:$0xff]  ;;  %v78_v5 = vld [vmem:[%s956_s1 + $0x208] sm:$0xff] }
   0x3   :  { %174 = vmatpush1.msra.mxu0 %v88_v1  ;;  %v74_v6 = vld [vmem:[%s956_s1 + $0x1e8] sm:$0xff]  ;;  %v73_v7 = vld [vmem:[%s956_s1 + $0x1e0] sm:$0xff]  ;;  %v68_v9 = vld [vmem:[%s956_s1 + $0x1b8] sm:$0xff] }
   0x4   :  { %175 = vmatprep.subr.mxu0 %v84_v2  ;;  %v69_v8 = vld [vmem:[%s956_s1 + $0x1c0] sm:$0xff]  ;;  %v64_v10 = vld [vmem:[%s956_s1 + $0x198] sm:$0xff]  ;;  %v63_v11 = vld [vmem:[%s956_s1 + $0x190] sm:$0xff] }
   0x5   :  { %176 = vmatpush1.msra.mxu0 %v83_v3  ;;  %v59_v12 = vld [vmem:[%s956_s1 + $0x170] sm:$0xff]  ;;  %v58_v13 = vld [vmem:[%s956_s1 + $0x168] sm:$0xff]  ;;  %v53_v18 = vld [vmem:[%s956_s1 + $0x140] sm:$0xff] }
   0x6   :  { %177 = vmatprep.subr.mxu0 %v79_v4  ;;  %v91_v14 = vld [vmem:[%s956_s1 + $0x270] sm:$0xff]  ;;  %v90_v15 = vld [vmem:[%s956_s1 + $0x268] sm:$0xff]  ;;  %v85_v19 = vld [vmem:[%s956_s1 + $0x240] sm:$0xff] }
   0x7   :  { %178 = vmatpush1.msra.mxu0 %v78_v5  ;;  %v54_v16 = vld [vmem:[%s956_s1 + $0x148] sm:$0xff]  ;;  %244 = vmatprep.subr.mxu1 %v91_v14  ;;  %v81_v20 = vld [vmem:[%s956_s1 + $0x220] sm:$0xff]  ;;  %v80_v22 = vld [vmem:[%s956_s1 + $0x218] sm:$0xff] }
   0x8   :  { %179 = vmatprep.subr.mxu0 %v74_v6  ;;  %v86_v17 = vld [vmem:[%s956_s1 + $0x248] sm:$0xff]  ;;  %245 = vmatpush1.msra.mxu1 %v90_v15  ;;  %v49_v21 = vld [vmem:[%s956_s1 + $0x120] sm:$0xff]  ;;  %v48_v23 = vld [vmem:[%s956_s1 + $0x118] sm:$0xff] }
   0x9   :  { %180 = vmatpush1.msra.mxu0 %v73_v7  ;;  %246 = vmatprep.subr.mxu1 %v86_v17  ;;  %v76_v24 = vld [vmem:[%s956_s1 + $0x1f8] sm:$0xff]  ;;  %v75_v26 = vld [vmem:[%s956_s1 + $0x1f0] sm:$0xff]  ;;  %v70_v30 = vld [vmem:[%s956_s1 + $0x1c8] sm:$0xff] }
   0xa   :  { %181 = vmatprep.subr.mxu0 %v69_v8  ;;  %247 = vmatpush1.msra.mxu1 %v85_v19  ;;  %v44_v25 = vld [vmem:[%s956_s1 + $0xf8] sm:$0xff]  ;;  %v43_v27 = vld [vmem:[%s956_s1 + $0xf0] sm:$0xff]  ;;  %v38_v31 = vld [vmem:[%s956_s1 + $0xc8] sm:$0xff] }
   0xb   :  { %182 = vmatpush1.msra.mxu0 %v68_v9  ;;  %248 = vmatprep.subr.mxu1 %v81_v20  ;;  %v71_v28 = vld [vmem:[%s956_s1 + $0x1d0] sm:$0xff]  ;;  %v66_v32 = vld [vmem:[%s956_s1 + $0x1a8] sm:$0xff]  ;;  %v65_v34 = vld [vmem:[%s956_s1 + $0x1a0] sm:$0xff] }
   0xc   :  { %183 = vmatprep.subr.mxu0 %v64_v10  ;;  %249 = vmatpush1.msra.mxu1 %v80_v22  ;;  %v39_v29 = vld [vmem:[%s956_s1 + $0xd0] sm:$0xff]  ;;  %v34_v33 = vld [vmem:[%s956_s1 + $0xa8] sm:$0xff]  ;;  %v33_v35 = vld [vmem:[%s956_s1 + $0xa0] sm:$0xff] }
   0xd   :  { %184 = vmatpush1.msra.mxu0 %v63_v11  ;;  %250 = vmatprep.subr.mxu1 %v76_v24  ;;  %v61_v36 = vld [vmem:[%s956_s1 + $0x180] sm:$0xff]  ;;  %v60_v38 = vld [vmem:[%s956_s1 + $0x178] sm:$0xff]  ;;  %v55_v42 = vld [vmem:[%s956_s1 + $0x150] sm:$0xff] }
   0xe   :  { %185 = vmatprep.subr.mxu0 %v59_v12  ;;  %251 = vmatpush1.msra.mxu1 %v75_v26  ;;  %v29_v37 = vld [vmem:[%s956_s1 + $0x80] sm:$0xff]  ;;  %v28_v39 = vld [vmem:[%s956_s1 + $0x78] sm:$0xff]  ;;  %v23_v43 = vld [vmem:[%s956_s1 + $0x50] sm:$0xff] }
   0xf   :  { %186 = vmatpush1.msra.mxu0 %v58_v13  ;;  %252 = vmatprep.subr.mxu1 %v71_v28  ;;  %v56_v40 = vld [vmem:[%s956_s1 + $0x158] sm:$0xff]  ;;  %v51_v44 = vld [vmem:[%s956_s1 + $0x130] sm:$0xff]  ;;  %v50_v46 = vld [vmem:[%s956_s1 + $0x128] sm:$0xff] }
  0x10   :  { %187 = vmatprep.subr.mxu0 %v54_v16  ;;  %253 = vmatpush1.msra.mxu1 %v70_v30  ;;  %v24_v41 = vld [vmem:[%s956_s1 + $0x58] sm:$0xff]  ;;  %v19_v45 = vld [vmem:[%s956_s1 + $0x30] sm:$0xff]  ;;  %v18_v47 = vld [vmem:[%s956_s1 + $0x28] sm:$0xff] }
  0x11   :  { %188 = vmatpush1.msra.mxu0 %v53_v18  ;;  %254 = vmatprep.subr.mxu1 %v66_v32  ;;  %v46_v48 = vld [vmem:[%s956_s1 + $0x108] sm:$0xff]  ;;  %v45_v50 = vld [vmem:[%s956_s1 + $0x100] sm:$0xff]  ;;  %v40_v54 = vld [vmem:[%s956_s1 + $0xd8] sm:$0xff] }
  0x12   :  { %189 = vmatprep.subr.mxu0 %v49_v21  ;;  %255 = vmatpush1.msra.mxu1 %v65_v34  ;;  %v14_v49 = vld [vmem:[%s956_s1 + $0x8] sm:$0xff]  ;;  %v13_v51 = vld [vmem:[%s956_s1] sm:$0xff]  ;;  %v168_v55 = vld [vmem:[%s956_s1 + $0x4d8] sm:$0xff] }
  0x13   :  { %190 = vmatpush1.msra.mxu0 %v48_v23  ;;  %256 = vmatprep.subr.mxu1 %v61_v36  ;;  %v41_v52 = vld [vmem:[%s956_s1 + $0xe0] sm:$0xff]  ;;  %v36_v56 = vld [vmem:[%s956_s1 + $0xb8] sm:$0xff]  ;;  %v35_v58 = vld [vmem:[%s956_s1 + $0xb0] sm:$0xff] }
  0x14   :  { %191 = vmatprep.subr.mxu0 %v44_v25  ;;  %257 = vmatpush1.msra.mxu1 %v60_v38  ;;  %v169_v53 = vld [vmem:[%s956_s1 + $0x4e0] sm:$0xff]  ;;  %v164_v57 = vld [vmem:[%s956_s1 + $0x4b8] sm:$0xff]  ;;  %v163_v59 = vld [vmem:[%s956_s1 + $0x4b0] sm:$0xff] }
  0x15   :  { %192 = vmatpush1.msra.mxu0 %v43_v27  ;;  %258 = vmatprep.subr.mxu1 %v56_v40  ;;  %v31_v60 = vld [vmem:[%s956_s1 + $0x90] sm:$0xff]  ;;  %v30_v62 = vld [vmem:[%s956_s1 + $0x88] sm:$0xff]  ;;  %v25_v2 = vld [vmem:[%s956_s1 + $0x60] sm:$0xff] }
  0x16   :  { %193 = vmatprep.subr.mxu0 %v39_v29  ;;  %259 = vmatpush1.msra.mxu1 %v55_v42  ;;  %v159_v61 = vld [vmem:[%s956_s1 + $0x490] sm:$0xff]  ;;  %v158_v63 = vld [vmem:[%s956_s1 + $0x488] sm:$0xff]  ;;  %v153_v3 = vld [vmem:[%s956_s1 + $0x460] sm:$0xff] }
  0x17   :  { %194 = vmatpush1.msra.mxu0 %v38_v31  ;;  %260 = vmatprep.subr.mxu1 %v51_v44  ;;  %v26_v0 = vld [vmem:[%s956_s1 + $0x68] sm:$0xff]  ;;  %v21_v4 = vld [vmem:[%s956_s1 + $0x40] sm:$0xff]  ;;  %v20_v6 = vld [vmem:[%s956_s1 + $0x38] sm:$0xff] }
  0x18   :  { %195 = vmatprep.subr.mxu0 %v34_v33  ;;  %261 = vmatpush1.msra.mxu1 %v50_v46  ;;  %v154_v1 = vld [vmem:[%s956_s1 + $0x468] sm:$0xff]  ;;  %v149_v5 = vld [vmem:[%s956_s1 + $0x440] sm:$0xff]  ;;  %v148_v7 = vld [vmem:[%s956_s1 + $0x438] sm:$0xff] }
  0x19   :  { %196 = vmatpush1.msra.mxu0 %v33_v35  ;;  %262 = vmatprep.subr.mxu1 %v46_v48  ;;  %v16_v8 = vld [vmem:[%s956_s1 + $0x18] sm:$0xff]  ;;  %v670_v10 = vld [vmem:[%s957_s0 + $0x8] sm:$0xff]  ;;  %v143_v11 = vld [vmem:[%s956_s1 + $0x410] sm:$0xff] }
  0x1a   :  { %197 = vmatprep.subr.mxu0 %v29_v37  ;;  %263 = vmatpush1.msra.mxu1 %v45_v50  ;;  %v144_v9 = vld [vmem:[%s956_s1 + $0x418] sm:$0xff]  ;;  %v15_v12 = vld [vmem:[%s956_s1 + $0x10] sm:$0xff]  ;;  %v138_v15 = vld [vmem:[%s956_s1 + $0x3e8] sm:$0xff] }
  0x1b   :  { %198 = vmatpush1.msra.mxu0 %v28_v39  ;;  %264 = vmatprep.subr.mxu1 %v41_v52  ;;  %v139_v13 = vld [vmem:[%s956_s1 + $0x3f0] sm:$0xff]  ;;  %v170_v16 = vld [vmem:[%s956_s1 + $0x4e8] sm:$0xff]  ;;  %v133_v19 = vld [vmem:[%s956_s1 + $0x3c0] sm:$0xff] }
  0x1c   :  { %199 = vmatprep.subr.mxu0 %v24_v41  ;;  %265 = vmatpush1.msra.mxu1 %v40_v54  ;;  %v171_v14 = vld [vmem:[%s956_s1 + $0x4f0] sm:$0xff]  ;;  %v134_v17 = vld [vmem:[%s956_s1 + $0x3c8] sm:$0xff]  ;;  %v165_v20 = vld [vmem:[%s956_s1 + $0x4c0] sm:$0xff] }
  0x1d   :  { %200 = vmatpush1.msra.mxu0 %v23_v43  ;;  %266 = vmatprep.subr.mxu1 %v36_v56  ;;  %v166_v18 = vld [vmem:[%s956_s1 + $0x4c8] sm:$0xff]  ;;  %v129_v21 = vld [vmem:[%s956_s1 + $0x3a0] sm:$0xff]  ;;  %v128_v23 = vld [vmem:[%s956_s1 + $0x398] sm:$0xff] }
  0x1e   :  { %201 = vmatprep.subr.mxu0 %v19_v45  ;;  %267 = vmatpush1.msra.mxu1 %v35_v58  ;;  %v161_v22 = vld [vmem:[%s956_s1 + $0x4a0] sm:$0xff]  ;;  %v160_v24 = vld [vmem:[%s956_s1 + $0x498] sm:$0xff]  ;;  %v123_v27 = vld [vmem:[%s956_s1 + $0x370] sm:$0xff] }
  0x1f   :  { %202 = vmatpush1.msra.mxu0 %v18_v47  ;;  %268 = vmatprep.subr.mxu1 %v31_v60  ;;  %v124_v25 = vld [vmem:[%s956_s1 + $0x378] sm:$0xff]  ;;  %v155_v28 = vld [vmem:[%s956_s1 + $0x470] sm:$0xff]  ;;  %v118_v31 = vld [vmem:[%s956_s1 + $0x348] sm:$0xff] }
  0x20   :  { %203 = vmatprep.subr.mxu0 %v14_v49  ;;  %269 = vmatpush1.msra.mxu1 %v30_v62  ;;  %v156_v26 = vld [vmem:[%s956_s1 + $0x478] sm:$0xff]  ;;  %v119_v29 = vld [vmem:[%s956_s1 + $0x350] sm:$0xff]  ;;  %v150_v32 = vld [vmem:[%s956_s1 + $0x448] sm:$0xff] }
  0x21   :  { %204 = vmatpush1.msra.mxu0 %v13_v51  ;;  %270 = vmatprep.subr.mxu1 %v26_v0  ;;  %v151_v30 = vld [vmem:[%s956_s1 + $0x450] sm:$0xff]  ;;  %v114_v33 = vld [vmem:[%s956_s1 + $0x328] sm:$0xff]  ;;  %v113_v35 = vld [vmem:[%s956_s1 + $0x320] sm:$0xff] }
  0x22   :  { %205 = vmatprep.subr.mxu0 %v169_v53  ;;  %271 = vmatpush1.msra.mxu1 %v25_v2  ;;  %v146_v34 = vld [vmem:[%s956_s1 + $0x428] sm:$0xff]  ;;  %v145_v36 = vld [vmem:[%s956_s1 + $0x420] sm:$0xff]  ;;  %v108_v39 = vld [vmem:[%s956_s1 + $0x2f8] sm:$0xff] }
  0x23   :  { %206 = vmatpush2.msra.mxu0 %v168_v55  ;;  %272 = vmatprep.subr.mxu1 %v21_v4  ;;  %v109_v37 = vld [vmem:[%s956_s1 + $0x300] sm:$0xff]  ;;  %v140_v40 = vld [vmem:[%s956_s1 + $0x3f8] sm:$0xff]  ;;  %v103_v43 = vld [vmem:[%s956_s1 + $0x2d0] sm:$0xff] }
  0x24   :  { %207 = vmatprep.subr.mxu0 %v164_v57  ;;  %273 = vmatpush1.msra.mxu1 %v20_v6  ;;  %v141_v38 = vld [vmem:[%s956_s1 + $0x400] sm:$0xff]  ;;  %v104_v41 = vld [vmem:[%s956_s1 + $0x2d8] sm:$0xff]  ;;  %v135_v44 = vld [vmem:[%s956_s1 + $0x3d0] sm:$0xff] }
  0x25   :  { %208 = vmatpush2.msra.mxu0 %v163_v59  ;;  %274 = vmatprep.subr.mxu1 %v16_v8  ;;  %v136_v42 = vld [vmem:[%s956_s1 + $0x3d8] sm:$0xff]  ;;  %v99_v45 = vld [vmem:[%s956_s1 + $0x2b0] sm:$0xff]  ;;  %v98_v47 = vld [vmem:[%s956_s1 + $0x2a8] sm:$0xff] }
  0x26   :  { %209 = vmatprep.subr.mxu0 %v159_v61  ;;  %237 = vmatprep.mubr.f32.mxu0 %v670_v10  ;;  %v131_v46 = vld [vmem:[%s956_s1 + $0x3b0] sm:$0xff]  ;;  %v130_v48 = vld [vmem:[%s956_s1 + $0x3a8] sm:$0xff]  ;;  %v93_v51 = vld [vmem:[%s956_s1 + $0x280] sm:$0xff] }
  0x27   :  { %210 = vmatpush2.msra.mxu0 %v158_v63  ;;  %275 = vmatpush1.msra.mxu1 %v15_v12  ;;  %v94_v49 = vld [vmem:[%s956_s1 + $0x288] sm:$0xff]  ;;  %v125_v52 = vld [vmem:[%s956_s1 + $0x380] sm:$0xff]  ;;  %v172_v54 = vld [vmem:[%s956_s1 + $0x4f8] sm:$0xff] }
  0x28   :  { %211 = vmatprep.subr.mxu0 %v154_v1  ;;  %276 = vmatprep.subr.mxu1 %v171_v14  ;;  %v126_v50 = vld [vmem:[%s956_s1 + $0x388] sm:$0xff]  ;;  %v802_v53 = vld [vmem:[%s957_s0] sm:$0xff]  ;;  %v92_v55 = vld [vmem:[%s956_s1 + $0x278] sm:$0xff] }
  0x29   :  { %212 = vmatpush2.msra.mxu0 %v153_v3  ;;  %277 = vmatpush2.msra.mxu1 %v170_v16  ;;  %v121_v56 = vld [vmem:[%s956_s1 + $0x360] sm:$0xff]  ;;  %v167_v57 = vld [vmem:[%s956_s1 + $0x4d0] sm:$0xff]  ;;  %v120_v58 = vld [vmem:[%s956_s1 + $0x358] sm:$0xff] }
  0x2a   :  { %213 = vmatprep.subr.mxu0 %v149_v5  ;;  %278 = vmatprep.subr.mxu1 %v166_v18  ;;  %v87_v59 = vld [vmem:[%s956_s1 + $0x250] sm:$0xff]  ;;  %v116_v60 = vld [vmem:[%s956_s1 + $0x338] sm:$0xff]  ;;  %v162_v61 = vld [vmem:[%s956_s1 + $0x4a8] sm:$0xff] }
  0x2b   :  { %214 = vmatpush2.msra.mxu0 %v148_v7  ;;  %279 = vmatpush2.msra.mxu1 %v165_v20  ;;  %v115_v62 = vld [vmem:[%s956_s1 + $0x330] sm:$0xff]  ;;  %v82_v63 = vld [vmem:[%s956_s1 + $0x228] sm:$0xff]  ;;  %v157_v1 = vld [vmem:[%s956_s1 + $0x480] sm:$0xff] }
  0x2c   :  { %215 = vmatprep.subr.mxu0 %v144_v9  ;;  %280 = vmatprep.subr.mxu1 %v161_v22  ;;  %v111_v0 = vld [vmem:[%s956_s1 + $0x310] sm:$0xff]  ;;  %v110_v2 = vld [vmem:[%s956_s1 + $0x308] sm:$0xff]  ;;  %v77_v3 = vld [vmem:[%s956_s1 + $0x200] sm:$0xff] }
  0x2d   :  { %216 = vmatpush2.msra.mxu0 %v143_v11  ;;  %281 = vmatpush2.msra.mxu1 %v160_v24  ;;  %v106_v4 = vld [vmem:[%s956_s1 + $0x2e8] sm:$0xff]  ;;  %v152_v5 = vld [vmem:[%s956_s1 + $0x458] sm:$0xff]  ;;  %v105_v6 = vld [vmem:[%s956_s1 + $0x2e0] sm:$0xff] }
  0x2e   :  { %217 = vmatprep.subr.mxu0 %v139_v13  ;;  %282 = vmatprep.subr.mxu1 %v156_v26  ;;  %v72_v7 = vld [vmem:[%s956_s1 + $0x1d8] sm:$0xff]  ;;  %v101_v8 = vld [vmem:[%s956_s1 + $0x2c0] sm:$0xff]  ;;  %v147_v9 = vld [vmem:[%s956_s1 + $0x430] sm:$0xff] }
  0x2f   :  { %218 = vmatpush2.msra.mxu0 %v138_v15  ;;  %283 = vmatpush2.msra.mxu1 %v155_v28  ;;  %v100_v11 = vld [vmem:[%s956_s1 + $0x2b8] sm:$0xff]  ;;  %v67_v12 = vld [vmem:[%s956_s1 + $0x1b0] sm:$0xff]  ;;  %v142_v14 = vld [vmem:[%s956_s1 + $0x408] sm:$0xff] }
  0x30   :  { %219 = vmatprep.subr.mxu0 %v134_v17  ;;  %284 = vmatprep.subr.mxu1 %v151_v30  ;;  %v96_v13 = vld [vmem:[%s956_s1 + $0x298] sm:$0xff]  ;;  %v95_v15 = vld [vmem:[%s956_s1 + $0x290] sm:$0xff]  ;;  %v62_v16 = vld [vmem:[%s956_s1 + $0x188] sm:$0xff] }
  0x31   :  { %220 = vmatpush2.msra.mxu0 %v133_v19  ;;  %285 = vmatpush2.msra.mxu1 %v150_v32  ;;  %v137_v17 = vld [vmem:[%s956_s1 + $0x3e0] sm:$0xff]  ;;  %v132_v19 = vld [vmem:[%s956_s1 + $0x3b8] sm:$0xff]  ;;  %v47_v22 = vld [vmem:[%s956_s1 + $0x110] sm:$0xff] }
  0x32   :  { %221 = vmatprep.subr.mxu0 %v129_v21  ;;  %286 = vmatprep.subr.mxu1 %v146_v34  ;;  %v57_v18 = vld [vmem:[%s956_s1 + $0x160] sm:$0xff]  ;;  %v52_v20 = vld [vmem:[%s956_s1 + $0x138] sm:$0xff]  ;;  %v127_v21 = vld [vmem:[%s956_s1 + $0x390] sm:$0xff] }
  0x33   :  { %222 = vmatpush2.msra.mxu0 %v128_v23  ;;  %287 = vmatpush2.msra.mxu1 %v145_v36  ;;  %v122_v23 = vld [vmem:[%s956_s1 + $0x368] sm:$0xff]  ;;  %v117_v24 = vld [vmem:[%s956_s1 + $0x340] sm:$0xff]  ;;  %v112_v26 = vld [vmem:[%s956_s1 + $0x318] sm:$0xff] }
  0x34   :  { %223 = vmatprep.subr.mxu0 %v124_v25  ;;  %288 = vmatprep.subr.mxu1 %v141_v38  ;;  %v37_v25 = vld [vmem:[%s956_s1 + $0xc0] sm:$0xff]  ;;  %v107_v28 = vld [vmem:[%s956_s1 + $0x2f0] sm:$0xff]  ;;  %v102_v30 = vld [vmem:[%s956_s1 + $0x2c8] sm:$0xff] }
  0x35   :  { %224 = vmatpush2.msra.mxu0 %v123_v27  ;;  %289 = vmatpush2.msra.mxu1 %v140_v40  ;;  %v32_v27 = vld [vmem:[%s956_s1 + $0x98] sm:$0xff]  ;;  %v97_v32 = vld [vmem:[%s956_s1 + $0x2a0] sm:$0xff] }
  0x36   :  { %225 = vmatprep.subr.mxu0 %v119_v29  ;;  %290 = vmatprep.subr.mxu1 %v136_v42  ;;  %v27_v29 = vld [vmem:[%s956_s1 + $0x70] sm:$0xff] }
  0x37   :  { %226 = vmatpush2.msra.mxu0 %v118_v31  ;;  %291 = vmatpush2.msra.mxu1 %v135_v44  ;;  %v22_v31 = vld [vmem:[%s956_s1 + $0x48] sm:$0xff] }
  0x38   :  { %227 = vmatprep.subr.mxu0 %v114_v33  ;;  %292 = vmatprep.subr.mxu1 %v131_v46  ;;  %v17_v33 = vld [vmem:[%s956_s1 + $0x20] sm:$0xff] }
  0x39   :  { %228 = vmatpush2.msra.mxu0 %v113_v35  ;;  %293 = vmatpush2.msra.mxu1 %v130_v48 }
  0x3a   :  { %229 = vmatprep.subr.mxu0 %v109_v37  ;;  %294 = vmatprep.subr.mxu1 %v126_v50 }
  0x3b   :  { %230 = vmatpush2.msra.mxu0 %v108_v39  ;;  %295 = vmatpush2.msra.mxu1 %v125_v52 }
  0x3c   :  { %231 = vmatprep.subr.mxu0 %v104_v41  ;;  %296 = vmatprep.subr.mxu1 %v121_v56 }
  0x3d   :  { %232 = vmatpush2.msra.mxu0 %v103_v43  ;;  %297 = vmatpush2.msra.mxu1 %v120_v58 }
  0x3e   :  { %233 = vmatprep.subr.mxu0 %v99_v45  ;;  %298 = vmatprep.subr.mxu1 %v116_v60 }
  0x3f   :  { %234 = vmatpush2.msra.mxu0 %v98_v47  ;;  %299 = vmatpush2.msra.mxu1 %v115_v62 }
  0x40   :  { %235 = vmatprep.subr.mxu0 %v94_v49  ;;  %300 = vmatprep.subr.mxu1 %v111_v0 }
  0x41   :  { %236 = vmatpush2.msra.mxu0 %v93_v51  ;;  %301 = vmatpush2.msra.mxu1 %v110_v2 }
  0x42   :  { %238 = vmatmul.mubr.f32.vlgmr.msra.gmra.mxu0 %v802_v53  ;;  %395 = vmatprep.subr.mxu0 %v172_v54 }
  0x43   :  { %396 = vmatpush3.msra.mxu0 %v92_v55  ;;  %302 = vmatprep.subr.mxu1 %v106_v4 }
  0x44   :  { %397 = vmatprep.subr.mxu0 %v167_v57  ;;  %303 = vmatpush2.msra.mxu1 %v105_v6 }
  0x45   :  { %398 = vmatpush3.msra.mxu0 %v87_v59  ;;  %304 = vmatprep.subr.mxu1 %v101_v8 }
  0x46   :  { %399 = vmatprep.subr.mxu0 %v162_v61  ;;  %305 = vmatpush2.msra.mxu1 %v100_v11 }
  0x47   :  { %400 = vmatpush3.msra.mxu0 %v82_v63  ;;  %306 = vmatprep.subr.mxu1 %v96_v13 }
  0x48   :  { %401 = vmatprep.subr.mxu0 %v157_v1  ;;  %307 = vmatpush2.msra.mxu1 %v95_v15 }
  0x49   :  { %402 = vmatpush3.msra.mxu0 %v77_v3  ;;  %308 = vmatprep.mubr.f32.mxu1 %v670_v10 }
  0x4a   :  { %403 = vmatprep.subr.mxu0 %v152_v5  ;;  %379 = vmatprep.mubr.f32.mxu0 %v670_v10  ;;  %v42_v10 = vld [vmem:[%s956_s1 + $0xe8] sm:$0xff] }
  0x4b   :  { %404 = vmatpush3.msra.mxu0 %v72_v7  ;;  %309 = vmatmul.mubr.f32.vlgmr.msra.gmra.mxu1 %v802_v53 }
  0x4c   :  { %405 = vmatprep.subr.mxu0 %v147_v9 }
  0x4d   :  { %406 = vmatpush3.msra.mxu0 %v67_v12 }
  0x4e   :  { %407 = vmatprep.subr.mxu0 %v142_v14 }
  0x4f   :  { %408 = vmatpush3.msra.mxu0 %v62_v16 }
  0x50   :  { %409 = vmatprep.subr.mxu0 %v137_v17 }
  0x51   :  { %410 = vmatpush3.msra.mxu0 %v57_v18 }
  0x52   :  { %411 = vmatprep.subr.mxu0 %v132_v19 }
  0x53   :  { %412 = vmatpush3.msra.mxu0 %v52_v20 }
  0x54   :  { %413 = vmatprep.subr.mxu0 %v127_v21 }
  0x55   :  { %414 = vmatpush3.msra.mxu0 %v47_v22 }
  0x56   :  { %415 = vmatprep.subr.mxu0 %v122_v23 }
  0x57   :  { %416 = vmatpush3.msra.mxu0 %v42_v10 }
  0x58   :  { %417 = vmatprep.subr.mxu0 %v117_v24 }
  0x59   :  { %418 = vmatpush3.msra.mxu0 %v37_v25 }
  0x5a   :  { %419 = vmatprep.subr.mxu0 %v112_v26 }
  0x5b   :  { %420 = vmatpush3.msra.mxu0 %v32_v27 }
  0x5c   :  { %421 = vmatprep.subr.mxu0 %v107_v28 }
  0x5d   :  { %422 = vmatpush3.msra.mxu0 %v27_v29 }
  0x5e   :  { %423 = vmatprep.subr.mxu0 %v102_v30 }
  0x5f   :  { %424 = vmatpush3.msra.mxu0 %v22_v31 }
  0x60   :  { %425 = vmatprep.subr.mxu0 %v97_v32 }
  0x61   :  { %426 = vmatpush3.msra.mxu0 %v17_v33 }
  0x62   :  { %380 = vmatmul.mubr.f32.vlgmr.msra.gmra.mxu0 %v802_v53 }
 0x102   :  { %v239_v34 = vpop.f32.mrf.mxu0 }
 0x103   :  { %385 = vst [vmem:[%s958_s2] sm:$0xff] %v239_v34 }
 0x104   :  { %v241_v35 = vpop.f32.mrf.mxu0 }
 0x105   :  { %386 = vst [vmem:[%s958_s2 + $0x8] sm:$0xff] %v241_v35 }
 0x10b   :  { %v310_v36 = vpop.f32.mrf.mxu1 }
 0x10c   :  { %387 = vst [vmem:[%s958_s2 + $0x10] sm:$0xff] %v310_v36 }
 0x10d   :  { %v312_v37 = vpop.f32.mrf.mxu1 }
 0x10e   :  { %388 = vst [vmem:[%s958_s2 + $0x18] sm:$0xff] %v312_v37 }
 0x122   :  { %v427_v38 = vpop.f32.mrf.mxu0 }
 0x124   :  { %v428_v39 = vpop.f32.mrf.mxu0 }
 0x125   :  { %v429_v40 = vadd.f32 %v428_v39, %v427_v38 }
 0x127   :  { %390 = vst.msk [vmem:[%s958_s2 + $0x20] sm:$0xff] %vm389_vm0, %v429_v40 }

</bundles_post_ra>
